<compile_context>
chip_gen: v7x
topology: tpu7x:2x2x1
jax: 0.10.0
libtpu: 0.0.40
codegen_flags: <defaults>
</compile_context>

<pallas_src>
import math

import jax
import jax.numpy as jnp
from jax.experimental import pallas as pl
from jax.experimental.pallas import tpu as pltpu

BASE = 9
LANES = 1024          # lane-dense last dim (multiple of 128 -> wide unmasked vst)
MAX_TILE_ROWS = 512   # 512 * 1024 * 4B = 2 MiB per f32 block (v5e-safe resident set)

# --- shared-range-reduction sincos (Cephes single precision) -----------------
_TWO_OVER_PI = 0.6366197723675814
# pi/2 split into three parts (Cody-Waite); high parts exact in f32.
_PIO2_1 = 1.5703125
_PIO2_2 = 4.837512969970703125e-4
_PIO2_3 = 7.54978995489188216e-8
# Minimax polynomials on [-pi/4, pi/4].
_S1, _S2, _S3 = -1.6666654611e-1, 8.3321608736e-3, -1.9515295891e-4
_C1, _C2, _C3 = 4.166664568298827e-2, -1.388731625493765e-3, 2.443315711809948e-5


def _sincos_f32(theta):
    """sin(theta), cos(theta) with one shared Cody-Waite range reduction."""
    k = jnp.floor(theta * _TWO_OVER_PI + 0.5)      # nearest multiple of pi/2
    r = theta - k * _PIO2_1
    r = r - k * _PIO2_2
    r = r - k * _PIO2_3
    q = k.astype(jnp.int32)

    z = r * r
    sin_r = r + r * z * (_S1 + z * (_S2 + z * _S3))
    cos_r = 1.0 + z * (-0.5 + z * (_C1 + z * (_C2 + z * _C3)))

    swap = (q & 1) != 0                            # odd quadrants swap sin<->cos
    s0 = jnp.where(swap, cos_r, sin_r)
    c0 = jnp.where(swap, sin_r, cos_r)
    s = jnp.where((q & 2) != 0, -s0, s0)           # quadrants 2,3 negate sin
    c = jnp.where(((q + 1) & 2) != 0, -c0, c0)     # quadrants 1,2 negate cos
    return s, c


def _modact_kernel(coef_ref, x_ref, o_ref):
    # coef_ref: SMEM (BASE,) f32 ; x_ref/o_ref: VMEM (tile_rows, LANES)
    x = x_ref[...].astype(jnp.float32)
    theta = x * (math.pi / BASE)

    s, c = _sincos_f32(theta)                      # one range reduction total
    t = 2.0 * c

    # Read all coefficients from SMEM into scalar locals once per tile.
    coefs = [coef_ref[j] for j in range(BASE)]

    # sum_{i=1..BASE} coef[i-1]*sin(i*theta) = sin(theta) * Q(cos theta) where
    # Q(u) = sum_{j=0..BASE-1} coef[j]*U_j(u).  Clenshaw for Chebyshev-U:
    #   b_j = a_j + 2u*b_{j+1} - b_{j+2};  Q = b_0.
    b_prev = coefs[BASE - 1]                       # scalar b_{N}
    b_cur = coefs[BASE - 2] + t * coefs[BASE - 1]  # b_{N-1}
    for j in range(BASE - 3, -1, -1):
        b_cur, b_prev = coefs[j] + t * b_cur - b_prev, b_cur

    o_ref[...] = (s * b_cur).astype(o_ref.dtype)


def _round_up(a, b):
    return (a + b - 1) // b * b


def modular_activation(x, coefficients):
    """Pallas wrapper: lane-dense slab, cdiv grid with masked partial last block."""
    orig_shape = x.shape
    orig_dtype = x.dtype
    n = x.size

    coefficients = jnp.asarray(coefficients, jnp.float32)
    assert coefficients.shape == (BASE,), "coefficients must have shape (BASE,)"

    # dtype-aware sublane multiple: 8 for f32, 16 for bf16, 32 for int8/fp8.
    sub = max(8, 32 // jnp.dtype(orig_dtype).itemsize)

    xf = x.reshape(-1)
    rows = pl.cdiv(n, LANES)
    total = rows * LANES
    if total != n:
        # Ragged size only: single minimal pad to the next lane multiple.  The
        # common NCHW case (n % 1024 == 0) takes the zero-copy path.  sin(0)=0
        # so the padded tail is benign; it is sliced off after the kernel.
        xf = jnp.pad(xf, (0, total - n))
    xf = xf.reshape(rows, LANES)

    if rows <= sub:
        tile_rows = rows            # block == full array dims (exact, legal)
    else:
        # Aim for >= 2 grid tiles so v7x megacore sharding engages; cap the
        # block at MAX_TILE_ROWS.  Partial last block is masked by Pallas.
        tile_rows = min(MAX_TILE_ROWS, _round_up(pl.cdiv(rows, 2), sub))
    grid = pl.cdiv(rows, tile_rows)

    out2d = pl.pallas_call(
        _modact_kernel,
        out_shape=jax.ShapeDtypeStruct((rows, LANES), orig_dtype),
        grid_spec=pltpu.PrefetchScalarGridSpec(
            num_scalar_prefetch=0,
            grid=(grid,),
            in_specs=[
                pl.BlockSpec(memory_space=pltpu.MemorySpace.SMEM),   # coefficients
                pl.BlockSpec((tile_rows, LANES), lambda r: (r, 0)),  # x tile
            ],
            out_specs=pl.BlockSpec((tile_rows, LANES), lambda r: (r, 0)),
        ),
        compiler_params=pltpu.CompilerParams(
            dimension_semantics=("parallel",),
        ),
    )(coefficients, xf)

    out = out2d.reshape(-1)
    if total != n:
        out = out[:n]
    return out.reshape(orig_shape)


def modular_activation_ref(x, coefficients):
    """Pure-JAX reference (mirrors the PyTorch forward)."""
    result = jnp.zeros_like(x)
    for i in range(1, BASE + 1):
        result = result + coefficients[i - 1] * jnp.sin(x * i * math.pi / BASE)
    return result


if __name__ == "__main__":
    key = jax.random.PRNGKey(0)
    # Small NCHW activation map: (batch=2, channels=4, 16, 16)
    x = jax.random.normal(key, (2, 4, 16, 16), dtype=jnp.float32)

    # Deterministic parameter init: matches nn.Parameter(torch.ones(base))
    coefficients = jnp.ones((BASE,), dtype=jnp.float32)

    out = modular_activation(x, coefficients)
    out = jax.block_until_ready(out)

    ref = modular_activation_ref(x, coefficients)
    assert out.shape == x.shape and out.dtype == x.dtype
    # Clenshaw + shared-range-reduction sincos differ from the per-term jnp.sin
    # reference by a few f32 ulps (~1e-6) for activation-scale inputs.
    assert jnp.allclose(out, ref, atol=1e-4, rtol=1e-5)

    print("KERNEL_OK")
</pallas_src>

<mosaic_0001>
module attributes {stable_mosaic.version = 11 : i64} {
  func.func @_modact_kernel(%arg0: i32, %arg1: memref<9xf32, #tpu.memory_space<smem>>, %arg2: memref<2x1024xf32, #tpu.memory_space<vmem>>, %arg3: memref<2x1024xf32, #tpu.memory_space<vmem>>) attributes {dimension_semantics = [#tpu.dimension_semantics<parallel>], iteration_bounds = array<i64: 1>, scalar_prefetch = 0 : i64, scratch_operands = 0 : i64, tpu.core_type = #tpu.core_type<tc>, window_params = [{transform_indices = @transform_0, window_bounds = array<i64: 9>}, {transform_indices = @transform_1, window_bounds = array<i64: 2, 1024>}, {transform_indices = @transform_2, window_bounds = array<i64: 2, 1024>}]} {
    %c0 = arith.constant 0 : index
    %c0_0 = arith.constant 0 : index
    %0 = vector.load %arg2[%c0, %c0_0] : memref<2x1024xf32, #tpu.memory_space<vmem>>, vector<2x1024xf32>
    %cst = arith.constant 0.34906584 : f32
    %1 = vector.broadcast %cst : f32 to vector<2x1024xf32>
    %2 = arith.mulf %0, %1 : vector<2x1024xf32>
    %cst_1 = arith.constant 0.636619746 : f32
    %3 = vector.broadcast %cst_1 : f32 to vector<2x1024xf32>
    %4 = arith.mulf %2, %3 : vector<2x1024xf32>
    %cst_2 = arith.constant 5.000000e-01 : f32
    %5 = vector.broadcast %cst_2 : f32 to vector<2x1024xf32>
    %6 = arith.addf %4, %5 : vector<2x1024xf32>
    %7 = math.floor %6 : vector<2x1024xf32>
    %cst_3 = arith.constant 1.5703125 : f32
    %8 = vector.broadcast %cst_3 : f32 to vector<2x1024xf32>
    %9 = arith.mulf %7, %8 : vector<2x1024xf32>
    %10 = arith.subf %2, %9 : vector<2x1024xf32>
    %cst_4 = arith.constant 4.83751297E-4 : f32
    %11 = vector.broadcast %cst_4 : f32 to vector<2x1024xf32>
    %12 = arith.mulf %7, %11 : vector<2x1024xf32>
    %13 = arith.subf %10, %12 : vector<2x1024xf32>
    %cst_5 = arith.constant 7.549790e-08 : f32
    %14 = vector.broadcast %cst_5 : f32 to vector<2x1024xf32>
    %15 = arith.mulf %7, %14 : vector<2x1024xf32>
    %16 = arith.subf %13, %15 : vector<2x1024xf32>
    %17 = arith.fptosi %7 : vector<2x1024xf32> to vector<2x1024xi32>
    %18 = arith.mulf %16, %16 : vector<2x1024xf32>
    %19 = arith.mulf %16, %18 : vector<2x1024xf32>
    %cst_6 = arith.constant -1.95152956E-4 : f32
    %20 = vector.broadcast %cst_6 : f32 to vector<2x1024xf32>
    %21 = arith.mulf %18, %20 : vector<2x1024xf32>
    %cst_7 = arith.constant 0.00833216123 : f32
    %22 = vector.broadcast %cst_7 : f32 to vector<2x1024xf32>
    %23 = arith.addf %22, %21 : vector<2x1024xf32>
    %24 = arith.mulf %18, %23 : vector<2x1024xf32>
    %cst_8 = arith.constant -0.166666552 : f32
    %25 = vector.broadcast %cst_8 : f32 to vector<2x1024xf32>
    %26 = arith.addf %25, %24 : vector<2x1024xf32>
    %27 = arith.mulf %19, %26 : vector<2x1024xf32>
    %28 = arith.addf %16, %27 : vector<2x1024xf32>
    %cst_9 = arith.constant 2.44331568E-5 : f32
    %29 = vector.broadcast %cst_9 : f32 to vector<2x1024xf32>
    %30 = arith.mulf %18, %29 : vector<2x1024xf32>
    %cst_10 = arith.constant -0.00138873165 : f32
    %31 = vector.broadcast %cst_10 : f32 to vector<2x1024xf32>
    %32 = arith.addf %31, %30 : vector<2x1024xf32>
    %33 = arith.mulf %18, %32 : vector<2x1024xf32>
    %cst_11 = arith.constant 0.0416666456 : f32
    %34 = vector.broadcast %cst_11 : f32 to vector<2x1024xf32>
    %35 = arith.addf %34, %33 : vector<2x1024xf32>
    %36 = arith.mulf %18, %35 : vector<2x1024xf32>
    %cst_12 = arith.constant -5.000000e-01 : f32
    %37 = vector.broadcast %cst_12 : f32 to vector<2x1024xf32>
    %38 = arith.addf %37, %36 : vector<2x1024xf32>
    %39 = arith.mulf %18, %38 : vector<2x1024xf32>
    %cst_13 = arith.constant 1.000000e+00 : f32
    %40 = vector.broadcast %cst_13 : f32 to vector<2x1024xf32>
    %41 = arith.addf %40, %39 : vector<2x1024xf32>
    %c1_i32 = arith.constant 1 : i32
    %42 = vector.broadcast %c1_i32 : i32 to vector<2x1024xi32>
    %43 = arith.andi %17, %42 : vector<2x1024xi32>
    %c0_i32 = arith.constant 0 : i32
    %44 = vector.broadcast %c0_i32 : i32 to vector<2x1024xi32>
    %45 = arith.cmpi ne, %43, %44 : vector<2x1024xi32>
    %46 = arith.select %45, %41, %28 : vector<2x1024xi1>, vector<2x1024xf32>
    %47 = arith.select %45, %28, %41 : vector<2x1024xi1>, vector<2x1024xf32>
    %c2_i32 = arith.constant 2 : i32
    %48 = vector.broadcast %c2_i32 : i32 to vector<2x1024xi32>
    %49 = arith.andi %17, %48 : vector<2x1024xi32>
    %c0_i32_14 = arith.constant 0 : i32
    %50 = vector.broadcast %c0_i32_14 : i32 to vector<2x1024xi32>
    %51 = arith.cmpi ne, %49, %50 : vector<2x1024xi32>
    %cst_15 = arith.constant 0.000000e+00 : f32
    %52 = vector.broadcast %cst_15 : f32 to vector<2x1024xf32>
    %53 = arith.subf %52, %46 : vector<2x1024xf32>
    %54 = arith.select %51, %53, %46 : vector<2x1024xi1>, vector<2x1024xf32>
    %c1_i32_16 = arith.constant 1 : i32
    %55 = vector.broadcast %c1_i32_16 : i32 to vector<2x1024xi32>
    %56 = arith.addi %17, %55 : vector<2x1024xi32>
    %c2_i32_17 = arith.constant 2 : i32
    %57 = vector.broadcast %c2_i32_17 : i32 to vector<2x1024xi32>
    %58 = arith.andi %56, %57 : vector<2x1024xi32>
    %c0_i32_18 = arith.constant 0 : i32
    %59 = vector.broadcast %c0_i32_18 : i32 to vector<2x1024xi32>
    %60 = arith.cmpi ne, %58, %59 : vector<2x1024xi32>
    %cst_19 = arith.constant 0.000000e+00 : f32
    %61 = vector.broadcast %cst_19 : f32 to vector<2x1024xf32>
    %62 = arith.subf %61, %47 : vector<2x1024xf32>
    %63 = arith.select %60, %62, %47 : vector<2x1024xi1>, vector<2x1024xf32>
    %cst_20 = arith.constant 2.000000e+00 : f32
    %64 = vector.broadcast %cst_20 : f32 to vector<2x1024xf32>
    %65 = arith.mulf %64, %63 : vector<2x1024xf32>
    %c0_21 = arith.constant 0 : index
    %66 = memref.load %arg1[%c0_21] : memref<9xf32, #tpu.memory_space<smem>>
    %c1 = arith.constant 1 : index
    %67 = memref.load %arg1[%c1] : memref<9xf32, #tpu.memory_space<smem>>
    %c2 = arith.constant 2 : index
    %68 = memref.load %arg1[%c2] : memref<9xf32, #tpu.memory_space<smem>>
    %c3 = arith.constant 3 : index
    %69 = memref.load %arg1[%c3] : memref<9xf32, #tpu.memory_space<smem>>
    %c4 = arith.constant 4 : index
    %70 = memref.load %arg1[%c4] : memref<9xf32, #tpu.memory_space<smem>>
    %c5 = arith.constant 5 : index
    %71 = memref.load %arg1[%c5] : memref<9xf32, #tpu.memory_space<smem>>
    %c6 = arith.constant 6 : index
    %72 = memref.load %arg1[%c6] : memref<9xf32, #tpu.memory_space<smem>>
    %c7 = arith.constant 7 : index
    %73 = memref.load %arg1[%c7] : memref<9xf32, #tpu.memory_space<smem>>
    %c8 = arith.constant 8 : index
    %74 = memref.load %arg1[%c8] : memref<9xf32, #tpu.memory_space<smem>>
    %75 = vector.broadcast %74 : f32 to vector<2x1024xf32>
    %76 = arith.mulf %65, %75 : vector<2x1024xf32>
    %77 = vector.broadcast %73 : f32 to vector<2x1024xf32>
    %78 = arith.addf %77, %76 : vector<2x1024xf32>
    %79 = arith.mulf %65, %78 : vector<2x1024xf32>
    %80 = vector.broadcast %72 : f32 to vector<2x1024xf32>
    %81 = arith.addf %80, %79 : vector<2x1024xf32>
    %82 = vector.broadcast %74 : f32 to vector<2x1024xf32>
    %83 = arith.subf %81, %82 : vector<2x1024xf32>
    %84 = arith.mulf %65, %83 : vector<2x1024xf32>
    %85 = vector.broadcast %71 : f32 to vector<2x1024xf32>
    %86 = arith.addf %85, %84 : vector<2x1024xf32>
    %87 = arith.subf %86, %78 : vector<2x1024xf32>
    %88 = arith.mulf %65, %87 : vector<2x1024xf32>
    %89 = vector.broadcast %70 : f32 to vector<2x1024xf32>
    %90 = arith.addf %89, %88 : vector<2x1024xf32>
    %91 = arith.subf %90, %83 : vector<2x1024xf32>
    %92 = arith.mulf %65, %91 : vector<2x1024xf32>
    %93 = vector.broadcast %69 : f32 to vector<2x1024xf32>
    %94 = arith.addf %93, %92 : vector<2x1024xf32>
    %95 = arith.subf %94, %87 : vector<2x1024xf32>
    %96 = arith.mulf %65, %95 : vector<2x1024xf32>
    %97 = vector.broadcast %68 : f32 to vector<2x1024xf32>
    %98 = arith.addf %97, %96 : vector<2x1024xf32>
    %99 = arith.subf %98, %91 : vector<2x1024xf32>
    %100 = arith.mulf %65, %99 : vector<2x1024xf32>
    %101 = vector.broadcast %67 : f32 to vector<2x1024xf32>
    %102 = arith.addf %101, %100 : vector<2x1024xf32>
    %103 = arith.subf %102, %95 : vector<2x1024xf32>
    %104 = arith.mulf %65, %103 : vector<2x1024xf32>
    %105 = vector.broadcast %66 : f32 to vector<2x1024xf32>
    %106 = arith.addf %105, %104 : vector<2x1024xf32>
    %107 = arith.subf %106, %99 : vector<2x1024xf32>
    %108 = arith.mulf %54, %107 : vector<2x1024xf32>
    %c0_22 = arith.constant 0 : index
    %c0_23 = arith.constant 0 : index
    %109 = vector.load %arg3[%c0_22, %c0_23] : memref<2x1024xf32, #tpu.memory_space<vmem>>, vector<2x1024xf32>
    tpu.vector_store %arg3[%c0_22, %c0_23], %108 {strides = array<i32>} : memref<2x1024xf32, #tpu.memory_space<vmem>>, vector<2x1024xf32>,
    return
  }
  func.func @transform_0(%arg0: i32) -> i32 {
    %c0_i32 = arith.constant 0 : i32
    %c0_i32_0 = arith.constant 0 : i32
    return %c0_i32 : i32
  }
  func.func @transform_1(%arg0: i32) -> (i32, i32) {
    %c0_i32 = arith.constant 0 : i32
    %c0_i32_0 = arith.constant 0 : i32
    return %arg0, %c0_i32 : i32, i32
  }
  func.func @transform_2(%arg0: i32) -> (i32, i32) {
    %c0_i32 = arith.constant 0 : i32
    %c0_i32_0 = arith.constant 0 : i32
    return %arg0, %c0_i32 : i32, i32
  }
}

</mosaic_0001>

<bundles_post_ra>
// kernel: tpu_custom_call.1
= control target key start
LH: loop header
LB: loop body
LE: loop exit
PB: predicated region body
PF: predicated region fallthrough
CT: control target
= control target key end

     0   :  { %7 = vsyncpa [#allocation5], 0  ;;  %s394_s0 = inlined_call_operand.hbm [shape: f32[9], index: 0, kind: input, shape index: {}]   ;;  %s395_s1 = inlined_call_operand.hbm [shape: f32[2,1024], index: 1, kind: input, shape index: {}]   ;;  %s396_s2 = inlined_call_operand.hbm [shape: f32[2,1024], index: 2, kind: output, shape index: {}]  }
   0x1   :  { %8 = vsyncpa [#allocation3], 0 }
   0x2   :  { %9 = vsyncpa [#allocation4], 0  ;;  %s218_s11 = scalar_lea.hbm %s394_s0, 16 }
   0x3   :  { %p219_p0 = scmp.ne.s32.totalorder %s394_s0, %s218_s11  ;;  %p222_p1 = scmp.lt.u32.totalorder %s218_s11, %s394_s0 }
   0x5   :  { %p224_p2 = pnand %p222_p1, %p219_p0 }
   0x7   :  { %227 = shalt.err (!%p224_p2)
}
   0x8   :  { %s278_s16 = smov [#allocation2]   ;;  %s279_s19 = smov [#allocation6]  }
   0x9   :  { %17 = dma.hbm_to_smem %s394_s0, 16, %s278_s16, [#allocation5]  }
   0xa   :  { %s24_s20 = sshll.u32 %s279_s19, 4  ;;  %s228_s23 = scalar_lea.hbm %s395_s1, 256  ;;  %s25_s20 = int_to_ptr.vmem [resolvable:$true] %s24_s20 }
   0xb   :  { %p229_p3 = scmp.ne.s32.totalorder %s395_s1, %s228_s23  ;;  %p232_p4 = scmp.lt.u32.totalorder %s228_s23, %s395_s1 }
   0xd   :  { %p234_p5 = pnand %p232_p4, %p229_p3 }
   0xf   :  { %237 = shalt.err (!%p234_p5)
}
  0x10   :  { %s238_s28 = scalar_lea.vmem %s25_s20, 256  ;;  %p243_p7 = scmp.lt.s32.totalorder %s25_s20, %s25_s20 }
  0x11   :  { %p239_p6 = scmp.ne.s32.totalorder %s25_s20, %s238_s28  ;;  %p244_p8 = scmp.lt.s32.totalorder %s238_s28, %s238_s28 }
  0x13   :  { %p245_p9 = por %p244_p8, %p243_p7 }
  0x15   :  { %p246_p10 = pnand %p245_p9, %p239_p6 }
  0x17   :  { %249 = shalt.err (!%p246_p10)
}
  0x18   :  { %27 = dma.hbm_to_vmem [thread:$0]  %s395_s1, 256, %s25_s20, [#allocation3]  }
  0x19   :  { %272 = dma.done.wait [#allocation5], 16  }
  0x1a   :  { %273 = vsyncadd [#allocation5], 4294967280 }
  0x1b   :  { %274 = dma.done.wait [#allocation3], 256  }
  0x1c   :  { %275 = vsyncadd [#allocation3], 4294967040 }
  0x1d   :  { %34 = sfence }
  0x1e   :  { %v35_v0 = vld [vmem:[#allocation6] sm:$0xff]  ;;  %v36_v1 = vld [vmem:[#allocation6 + $0x8] sm:$0xff]  ;;  %s210_s1 = sld [smem:[#allocation2 + $0x8]]  ;;  %s209_s30 = sld [smem:[#allocation2 + $0x7]] }
  0x1f   :  { %v37_v2 = vmul.f32 0.34906584, %v35_v0  ;;  %v38_v3 = vmul.f32 0.34906584, %v36_v1  ;;  %s208_s3 = sld [smem:[#allocation2 + $0x6]]  ;;  %s207_s4 = sld [smem:[#allocation2 + $0x5]] }
  0x20   :  { %s206_s5 = sld [smem:[#allocation2 + $0x4]]  ;;  %s205_s6 = sld [smem:[#allocation2 + $0x3]] }
  0x21   :  { %v39_v4 = vmul.f32 0.63661975, %v37_v2  ;;  %v40_v5 = vmul.f32 0.63661975, %v38_v3  ;;  %s204_s7 = sld [smem:[#allocation2 + $0x2]]  ;;  %s203_s8 = sld [smem:[#allocation2 + $0x1]] }
  0x22   :  { %s119_s9 = sld [smem:[#allocation2]]  ;;  %s280_s10 = smov [#allocation7]  }
  0x23   :  { %v41_v6 = vadd.f32 0.5, %v39_v4  ;;  %v42_v7 = vadd.f32 0.5, %v40_v5  ;;  %s193_s11 = sshll.u32 %s280_s10, 4  ;;  %s194_s11 = int_to_ptr.vmem [resolvable:$true] %s193_s11 }
  0x24   :  { %s250_s12 = scalar_lea.vmem %s194_s11, 256  ;;  %p255_p12 = scmp.lt.s32.totalorder %s194_s11, %s194_s11 }
  0x25   :  { %v43_v8 = vfloor.f32 %v41_v6  ;;  %v44_v9 = vfloor.f32 %v42_v7  ;;  %v128_v7 = vstv %s210_s1  ;;  %p251_p11 = scmp.ne.s32.totalorder %s194_s11, %s250_s12  ;;  %p256_p13 = scmp.lt.s32.totalorder %s250_s12, %s250_s12 }
  0x27   :  { %v45_v10 = vmul.f32 1.5703125, %v43_v8  ;;  %v49_v11 = vmul.f32 0.0004837513, %v43_v8  ;;  %v46_v12 = vmul.f32 1.5703125, %v44_v9  ;;  %v53_v14 = vmul.f32 7.54979e-08, %v43_v8  ;;  %p257_p0 = por %p256_p13, %p255_p12 }
  0x28   :  { %v50_v15 = vmul.f32 0.0004837513, %v44_v9  ;;  %v54_v17 = vmul.f32 7.54979e-08, %v44_v9  ;;  %v211_v24 = vtrunc.f32 %v43_v8  ;;  %v213_v27 = vtrunc.f32 %v44_v9 }
  0x29   :  { %v47_v13 = vsub.f32 %v37_v2, %v45_v10  ;;  %v48_v16 = vsub.f32 %v38_v3, %v46_v12  ;;  %v131_v10 = vstv %s209_s30  ;;  %p258_p1 = pnand %p257_p0, %p251_p11 }
  0x2a   :  { %v320_v34 = vcvt.f32.s32 %v211_v24  ;;  %v322_v38 = vcvt.f32.s32 %v213_v27 }
  0x2b   :  { %v51_v18 = vsub.f32 %v47_v13, %v49_v11  ;;  %v52_v19 = vsub.f32 %v48_v16, %v50_v15  ;;  %v136_v15 = vstv %s208_s3 }
  0x2c   :  { %v107_v48 = vadd.s32 1, %v320_v34  ;;  %v91_v49 = vand.u32 1, %v320_v34  ;;  %v108_v52 = vadd.s32 1, %v322_v38  ;;  %v92_v54 = vand.u32 1, %v322_v38 }
  0x2d   :  { %v55_v20 = vsub.f32 %v51_v18, %v53_v14  ;;  %v56_v21 = vsub.f32 %v52_v19, %v54_v17 }
  0x2e   :  { %v109_v58 = vand.u32 2, %v107_v48  ;;  %vm330_vm0 = vcmp.ne.s32.totalorder %v91_v49, 0  ;;  %v110_v62 = vand.u32 2, %v108_v52  ;;  %vm338_vm1 = vcmp.ne.s32.totalorder %v92_v54, 0 }
  0x2f   :  { %v59_v22 = vmul.f32 %v55_v20, %v55_v20  ;;  %v60_v23 = vmul.f32 %v56_v21, %v56_v21  ;;  %v171_v52 = vstv %s203_s8 }
  0x30   :  { %vm111_vm2 = vcmp.ne.s32.totalorder %v109_v58, 0  ;;  %vm112_vm3 = vcmp.ne.s32.totalorder %v110_v62, 0  ;;  %v99_v58 = vand.u32 2, %v320_v34 }
  0x31   :  { %v63_v25 = vmul.f32 -0.00019515296, %v59_v22  ;;  %v75_v26 = vmul.f32 2.4433157e-05, %v59_v22  ;;  %v64_v28 = vmul.f32 -0.00019515296, %v60_v23  ;;  %v61_v35 = vmul.f32 %v59_v22, %v55_v20 }
  0x32   :  { %v76_v29 = vmul.f32 2.4433157e-05, %v60_v23  ;;  %v62_v39 = vmul.f32 %v60_v23, %v56_v21  ;;  %vm101_vm4 = vcmp.ne.s32.totalorder %v99_v58, 0 }
  0x33   :  { %v65_v30 = vadd.f32 0.008332161, %v63_v25  ;;  %v77_v31 = vadd.f32 -0.0013887316, %v75_v26  ;;  %v66_v32 = vadd.f32 0.008332161, %v64_v28 }
  0x34   :  { %v78_v33 = vadd.f32 -0.0013887316, %v76_v29  ;;  %v150_v29 = vstv %s206_s5 }
  0x35   :  { %v67_v36 = vmul.f32 %v65_v30, %v59_v22  ;;  %v79_v37 = vmul.f32 %v77_v31, %v59_v22  ;;  %v68_v40 = vmul.f32 %v66_v32, %v60_v23 }
  0x36   :  { %v80_v41 = vmul.f32 %v78_v33, %v60_v23 }
  0x37   :  { %v69_v42 = vadd.f32 -0.16666655, %v67_v36  ;;  %v81_v43 = vadd.f32 0.041666646, %v79_v37  ;;  %v70_v44 = vadd.f32 -0.16666655, %v68_v40  ;;  %v157_v37 = vstv %s205_s6 }
  0x38   :  { %v82_v45 = vadd.f32 0.041666646, %v80_v41 }
  0x39   :  { %v71_v46 = vmul.f32 %v69_v42, %v61_v35  ;;  %v83_v47 = vmul.f32 %v81_v43, %v59_v22  ;;  %v72_v50 = vmul.f32 %v70_v44, %v62_v39 }
  0x3a   :  { %v84_v51 = vmul.f32 %v82_v45, %v60_v23  ;;  %v164_v45 = vstv %s204_s7 }
  0x3b   :  { %v85_v53 = vadd.f32 -0.5, %v83_v47  ;;  %v328_v56 = vadd.f32 %v71_v46, %v55_v20  ;;  %v334_v60 = vadd.f32 %v72_v50, %v56_v21 }
  0x3c   :  { %v86_v55 = vadd.f32 -0.5, %v84_v51 }
  0x3d   :  { %v87_v57 = vmul.f32 %v85_v53, %v59_v22  ;;  %v143_v22 = vstv %s207_s4 }
  0x3e   :  { %v88_v61 = vmul.f32 %v86_v55, %v60_v23 }
  0x3f   :  { %v336_v63 = vadd.f32 1.0, %v87_v57 }
  0x40   :  { %v342_v1 = vadd.f32 1.0, %v88_v61 }
  0x41   :  { %v97_v2 = vsel %vm330_vm0, %v328_v56, %v336_v63  ;;  %v95_v57 = vsel %vm330_vm0, %v336_v63, %v328_v56 }
  0x42   :  { %v113_v3 = vsub.f32 0.0, %v97_v2  ;;  %v98_v4 = vsel %vm338_vm1, %v334_v60, %v342_v1  ;;  %v96_v62 = vsel %vm338_vm1, %v342_v1, %v334_v60 }
  0x43   :  { %v114_v5 = vsub.f32 0.0, %v98_v4  ;;  %v104_v59 = vsub.f32 0.0, %v96_v62 }
  0x44   :  { %v115_v6 = vsel %vm111_vm2, %v113_v3, %v97_v2  ;;  %v100_v2 = vand.u32 2, %v322_v38 }
  0x45   :  { %v352_v8 = vmul.f32 2.0, %v115_v6  ;;  %v116_v9 = vsel %vm112_vm3, %v114_v5, %v98_v4  ;;  %v103_v5 = vsub.f32 0.0, %v95_v57  ;;  %v178_v6 = vstv %s119_s9 }
  0x46   :  { %v354_v11 = vmul.f32 2.0, %v116_v9  ;;  %vm102_vm5 = vcmp.ne.s32.totalorder %v100_v2, 0 }
  0x47   :  { %v129_v12 = vmul.f32 %v128_v7, %v352_v8  ;;  %v105_v63 = vsel %vm101_vm4, %v103_v5, %v95_v57  ;;  %v106_v0 = vsel %vm102_vm5, %v104_v59, %v96_v62 }
  0x48   :  { %v130_v13 = vmul.f32 %v128_v7, %v354_v11 }
  0x49   :  { %v132_v14 = vadd.f32 %v131_v10, %v129_v12 }
  0x4a   :  { %v133_v16 = vadd.f32 %v131_v10, %v130_v13 }
  0x4b   :  { %v134_v17 = vmul.f32 %v132_v14, %v352_v8 }
  0x4c   :  { %v135_v18 = vmul.f32 %v133_v16, %v354_v11 }
  0x4d   :  { %v137_v19 = vadd.f32 %v136_v15, %v134_v17 }
  0x4e   :  { %v138_v20 = vadd.f32 %v136_v15, %v135_v18 }
  0x4f   :  { %v139_v21 = vsub.f32 %v137_v19, %v128_v7 }
  0x50   :  { %v140_v23 = vsub.f32 %v138_v20, %v128_v7 }
  0x51   :  { %v141_v24 = vmul.f32 %v139_v21, %v352_v8 }
  0x52   :  { %v142_v25 = vmul.f32 %v140_v23, %v354_v11 }
  0x53   :  { %v144_v26 = vadd.f32 %v143_v22, %v141_v24 }
  0x54   :  { %v145_v27 = vadd.f32 %v143_v22, %v142_v25 }
  0x55   :  { %v146_v28 = vsub.f32 %v144_v26, %v132_v14 }
  0x56   :  { %v147_v30 = vsub.f32 %v145_v27, %v133_v16 }
  0x57   :  { %v148_v31 = vmul.f32 %v146_v28, %v352_v8 }
  0x58   :  { %v149_v32 = vmul.f32 %v147_v30, %v354_v11 }
  0x59   :  { %v151_v33 = vadd.f32 %v150_v29, %v148_v31 }
  0x5a   :  { %v152_v35 = vadd.f32 %v150_v29, %v149_v32 }
  0x5b   :  { %v153_v36 = vsub.f32 %v151_v33, %v139_v21 }
  0x5c   :  { %v154_v39 = vsub.f32 %v152_v35, %v140_v23 }
  0x5d   :  { %v155_v40 = vmul.f32 %v153_v36, %v352_v8 }
  0x5e   :  { %v156_v41 = vmul.f32 %v154_v39, %v354_v11 }
  0x5f   :  { %v158_v42 = vadd.f32 %v157_v37, %v155_v40 }
  0x60   :  { %v159_v43 = vadd.f32 %v157_v37, %v156_v41 }
  0x61   :  { %v160_v44 = vsub.f32 %v158_v42, %v146_v28 }
  0x62   :  { %v161_v46 = vsub.f32 %v159_v43, %v147_v30 }
  0x63   :  { %v162_v47 = vmul.f32 %v160_v44, %v352_v8 }
  0x64   :  { %v163_v48 = vmul.f32 %v161_v46, %v354_v11 }
  0x65   :  { %v165_v49 = vadd.f32 %v164_v45, %v162_v47 }
  0x66   :  { %v166_v50 = vadd.f32 %v164_v45, %v163_v48 }
  0x67   :  { %v167_v51 = vsub.f32 %v165_v49, %v153_v36 }
  0x68   :  { %v168_v53 = vsub.f32 %v166_v50, %v154_v39 }
  0x69   :  { %v169_v54 = vmul.f32 %v167_v51, %v352_v8 }
  0x6a   :  { %v170_v55 = vmul.f32 %v168_v53, %v354_v11 }
  0x6b   :  { %v172_v61 = vadd.f32 %v171_v52, %v169_v54 }
  0x6c   :  { %v173_v3 = vadd.f32 %v171_v52, %v170_v55 }
  0x6d   :  { %v174_v4 = vsub.f32 %v172_v61, %v160_v44 }
  0x6e   :  { %v175_v7 = vsub.f32 %v173_v3, %v161_v46 }
  0x6f   :  { %v176_v9 = vmul.f32 %v174_v4, %v352_v8 }
  0x70   :  { %v177_v34 = vmul.f32 %v175_v7, %v354_v11 }
  0x71   :  { %v179_v56 = vadd.f32 %v178_v6, %v176_v9 }
  0x72   :  { %v180_v10 = vadd.f32 %v178_v6, %v177_v34 }
  0x73   :  { %v181_v12 = vsub.f32 %v179_v56, %v167_v51 }
  0x74   :  { %v182_v38 = vsub.f32 %v180_v10, %v168_v53 }
  0x75   :  { %v183_v60 = vmul.f32 %v181_v12, %v105_v63 }
  0x76   :  { %v184_v1 = vmul.f32 %v182_v38, %v106_v0 }
  0x77   :  { %185 = vst [vmem:[#allocation7] sm:$0xff] %v183_v60 }
  0x78   :  { %186 = vst [vmem:[#allocation7 + $0x8] sm:$0xff] %v184_v1 }
  0x79   :  { %261 = shalt.err (!%p258_p1)
}
  0x7a   :  { %s262_s15 = scalar_lea.hbm %s396_s2, 256 }
  0x7b   :  { %p263_p2 = scmp.ne.s32.totalorder %s396_s2, %s262_s15  ;;  %p266_p3 = scmp.lt.u32.totalorder %s262_s15, %s396_s2 }
  0x7d   :  { %p268_p4 = pnand %p266_p3, %p263_p2 }
  0x7f   :  { %271 = shalt.err (!%p268_p4)
}
  0x80   :  { %196 = dma.vmem_to_hbm [thread:$0]  %s194_s11, 256, %s396_s2, [#allocation4]  }
  0x81   :  { %276 = dma.done.wait [#allocation4], 256  }
  0x82   :  { %277 = vsyncadd [#allocation4], 4294967040 }
  0x83   :  { %200 = vsyncpa [#allocation3], 1 }
  0x84   :  { %201 = vsyncpa [#allocation4], 1 }
  0x85   :  { %202 = vsyncpa [#allocation5], 1 }

</bundles_post_ra>
